<compile_context>
chip_gen: v6e
topology: v6e:2x2x1
jax: 0.10.0
libtpu: 0.0.40
codegen_flags: <defaults>
</compile_context>

<pallas_src>
import functools

import numpy as np

import jax
import jax.numpy as jnp
from jax.experimental import pallas as pl
from jax.experimental.pallas import tpu as pltpu


# ----------------------------------------------------------------------------
# Kernel
# ----------------------------------------------------------------------------
def _convblock_kernel(x_ref, b1_ref, b2_ref, b3_ref, ss1_ref, ss2_ref, ss3_ref,
                      o_ref, *, stage_dims, pad, dils):
    """Fused (conv3x3 -> BN -> ReLU) x3 for one tile of B batch images.

    x_ref:     (B, H, W*Cin)                f32 input (W and C flattened on lanes)
    b{i}_ref:  (3*Win_i*Cin_i, Wo_i*Cout_i) bf16 banded conv weights (ky folded into K)
    ss{i}_ref: (2, Wo_i*Cout_i)             f32: row 0 = BN scale, row 1 = BN shift
    o_ref:     (B, Ho3, Wo3*Cout3)          f32 output (lane-dense, 128-wide multiples)
    stage_dims: ((Hin, Ho, Wo, Cout), ...)  static per-stage dims
    """

    def stage(y, band_ref, ss_ref, dims, dil):
        h_in, h_out, w_out, c_out = dims
        b = y.shape[0]
        wc = y.shape[2]                      # Win * Cin of this stage

        # In-register zero padding along H (W padding is baked into the band).
        if pad > 0:
            zrow = jnp.zeros((b, pad, wc), jnp.float32)
            y = jnp.concatenate([zrow, y, zrow], axis=1)   # (B, Hin+2p, WC)

        # 3x3 conv as ONE MXU matmul: the three ky-shifted row blocks are
        # concatenated along the contraction axis (K = 3*Win*Cin).
        lhs = jnp.concatenate(
            [y[:, ky * dil:ky * dil + h_out, :] for ky in range(3)], axis=-1)
        lhs = lhs.reshape(b * h_out, 3 * wc).astype(jnp.bfloat16)   # one bf16 cast
        acc = jnp.dot(lhs, band_ref[...],                           # (B*Ho, Wo*Cout)
                      preferred_element_type=jnp.float32)

        # BN (inference stats) + ReLU epilogue in f32, lane-dense.
        out = jnp.maximum(acc * ss_ref[0:1, :] + ss_ref[1:2, :], 0.0)
        return out.reshape(b, h_out, w_out * c_out)

    y = x_ref[...]                                                   # (B, H, W*Cin) f32
    per_stage = ((b1_ref, ss1_ref), (b2_ref, ss2_ref), (b3_ref, ss3_ref))
    for (band_ref, ss_ref), dims, dil in zip(per_stage, stage_dims, dils):
        y = stage(y, band_ref, ss_ref, dims, dil)

    o_ref[...] = y.astype(o_ref.dtype)


# ----------------------------------------------------------------------------
# Host-side (one-time) weight preparation
# ----------------------------------------------------------------------------
def _make_band(w_raw, w_in, w_out, pad, dil):
    """Merged-ky banded conv-along-W weights: shape (3*Win*Cin, Wo*Cout).

    K ordering is [ky][win][ci] (matching the kernel's lane-concat of the
    three ky-shifted slices); out-of-range W taps are simply absent, which
    implements W zero-padding.
    """
    w_raw = np.asarray(w_raw, np.float32)                 # (3, 3, Cin, Cout)
    _, _, cin, cout = w_raw.shape
    band = np.zeros((3, w_in, cin, w_out, cout), np.float32)
    wo = np.arange(w_out)
    for ky in range(3):
        for kx in range(3):
            win = wo - pad + kx * dil
            m = (win >= 0) & (win < w_in)
            band[ky, win[m], :, wo[m], :] += w_raw[ky, kx]   # distinct (win,wo) pairs
    return jnp.asarray(band.reshape(3 * w_in * cin, w_out * cout), jnp.bfloat16)


def _make_scale_shift(bn, w_out, eps):
    """(2, Wo*Cout) f32: row 0 = BN scale, row 1 = BN shift, tiled over Wo."""
    scale = np.asarray(bn["gamma"], np.float32) / np.sqrt(
        np.asarray(bn["var"], np.float32) + eps)
    shift = np.asarray(bn["beta"], np.float32) - np.asarray(bn["mean"], np.float32) * scale
    return jnp.asarray(np.stack([np.tile(scale, w_out), np.tile(shift, w_out)], axis=0),
                       jnp.float32)


def prepare_convblock(params, *, in_channels, height, width,
                      dilation=1, padding=1, eps=1e-5):
    """Precompute bands / BN scale-shift / static dims ONCE at param-load time."""
    pad = int(padding)
    dils = (1, int(dilation), int(dilation))   # conv1 has no dilation in the module
    w_all = (params["w1"], params["w2"], params["w3"])
    bn_all = (params["bn1"], params["bn2"], params["bn3"])

    stage_dims, bands, ss = [], [], []
    h_in, w_in, c_in = int(height), int(width), int(in_channels)
    for wgt, bn, d in zip(w_all, bn_all, dils):
        c_out = int(wgt.shape[-1])
        h_out = h_in + 2 * pad - 2 * d          # conv3x3, stride 1
        w_out = w_in + 2 * pad - 2 * d
        stage_dims.append((h_in, w_in, c_in, h_out, w_out, c_out))
        bands.append(_make_band(wgt, w_in, w_out, pad, d))
        ss.append(_make_scale_shift(bn, w_out, eps))
        h_in, w_in, c_in = h_out, w_out, c_out

    return dict(bands=tuple(bands), scale_shift=tuple(ss),
                stage_dims=tuple(stage_dims), pad=pad, dils=dils)


def _pick_batch_tile(n, h_out, target_m=256):
    """Largest divisor of n with tile*h_out <= target_m (keeps MXU M useful
    while bounding per-step VMEM)."""
    best = 1
    for t in range(1, n + 1):
        if n % t == 0 and t * h_out <= target_m:
            best = t
    return best


# ----------------------------------------------------------------------------
# Forward (NCHW in / NCHW out, matching the PyTorch module)
# ----------------------------------------------------------------------------
def convblock_forward(x_nchw, bands, scale_shift, *, stage_dims, pad, dils, batch_tile):
    n, cin, h, w = x_nchw.shape
    assert (h, w, cin) == (stage_dims[0][0], stage_dims[0][1], stage_dims[0][2])
    assert n % batch_tile == 0
    ho3, wo3, co3 = stage_dims[2][3], stage_dims[2][4], stage_dims[2][5]

    # NCHW -> (N, H, W*C): one layout pass at entry (lane axis = W*C).
    x_flat = jnp.transpose(x_nchw, (0, 2, 3, 1)).reshape(n, h, w * cin)
    x_flat = x_flat.astype(jnp.float32)

    kernel = functools.partial(
        _convblock_kernel,
        stage_dims=tuple((s[0], s[3], s[4], s[5]) for s in stage_dims),
        pad=pad, dils=dils)

    out_flat = pl.pallas_call(
        kernel,
        out_shape=jax.ShapeDtypeStruct((n, ho3, wo3 * co3), jnp.float32),
        grid_spec=pltpu.PrefetchScalarGridSpec(
            num_scalar_prefetch=0,
            grid=(n // batch_tile,),
            in_specs=[
                pl.BlockSpec((batch_tile, h, w * cin), lambda b: (b, 0, 0)),
                pl.BlockSpec(bands[0].shape, lambda b: (0, 0)),
                pl.BlockSpec(bands[1].shape, lambda b: (0, 0)),
                pl.BlockSpec(bands[2].shape, lambda b: (0, 0)),
                pl.BlockSpec(scale_shift[0].shape, lambda b: (0, 0)),
                pl.BlockSpec(scale_shift[1].shape, lambda b: (0, 0)),
                pl.BlockSpec(scale_shift[2].shape, lambda b: (0, 0)),
            ],
            out_specs=pl.BlockSpec((batch_tile, ho3, wo3 * co3), lambda b: (b, 0, 0)),
        ),
        compiler_params=pltpu.CompilerParams(
            dimension_semantics=("parallel",)),
    )(x_flat, *bands, *scale_shift)

    out = out_flat.reshape(n, ho3, wo3, co3)
    return jnp.transpose(out, (0, 3, 1, 2))                 # back to NCHW


# ----------------------------------------------------------------------------
# Parameters + pure-JAX reference (for correctness checking)
# ----------------------------------------------------------------------------
def init_convblock_params(key, inplanes, planes1, planes2):
    ks = jax.random.split(key, 15)

    def conv_w(k, cin, cout):
        # HWIO layout (equivalent to PyTorch's (Cout,Cin,3,3) up to transpose).
        return jax.random.normal(k, (3, 3, cin, cout), jnp.float32) * 0.1

    def bn(k0, k1, k2, k3, c):
        return dict(
            gamma=jax.random.uniform(k0, (c,), jnp.float32, 0.5, 1.5),
            beta=jax.random.normal(k1, (c,), jnp.float32) * 0.1,
            mean=jax.random.normal(k2, (c,), jnp.float32) * 0.1,
            var=jax.random.uniform(k3, (c,), jnp.float32, 0.5, 1.5),
        )

    return {
        "w1": conv_w(ks[0], inplanes, planes1),
        "bn1": bn(ks[1], ks[2], ks[3], ks[4], planes1),
        "w2": conv_w(ks[5], planes1, planes2),
        "bn2": bn(ks[6], ks[7], ks[8], ks[9], planes2),
        "w3": conv_w(ks[10], planes2, planes2),
        "bn3": bn(ks[11], ks[12], ks[13], ks[14], planes2),
    }


def _ref_convblock(x_nchw, params, dilation, padding, eps=1e-5):
    dils = (1, dilation, dilation)
    y = x_nchw
    for i, d in enumerate(dils, start=1):
        wgt, bn = params[f"w{i}"], params[f"bn{i}"]
        y = jax.lax.conv_general_dilated(
            y, wgt, window_strides=(1, 1),
            padding=((padding, padding), (padding, padding)),
            rhs_dilation=(d, d),
            dimension_numbers=("NCHW", "HWIO", "NCHW"))
        scale = bn["gamma"] / jnp.sqrt(bn["var"] + eps)
        shift = bn["beta"] - bn["mean"] * scale
        y = y * scale[None, :, None, None] + shift[None, :, None, None]
        y = jnp.maximum(y, 0.0)
    return y


if __name__ == "__main__":
    # Convblock(inplanes=4, planes1=8, planes2=8, dilation=1, padding=1)
    inplanes, planes1, planes2 = 4, 8, 8
    dilation, padding = 1, 1
    n, h, w = 2, 16, 16

    key = jax.random.PRNGKey(0)
    k_x, k_p = jax.random.split(key)
    x = jax.random.normal(k_x, (n, inplanes, h, w), jnp.float32)   # NCHW
    params = init_convblock_params(k_p, inplanes, planes1, planes2)

    # One-time prep (bands, BN scale/shift, static dims) — not per call.
    prep = prepare_convblock(params, in_channels=inplanes, height=h, width=w,
                             dilation=dilation, padding=padding)
    b_tile = _pick_batch_tile(n, prep["stage_dims"][-1][3])

    fwd = jax.jit(functools.partial(
        convblock_forward,
        stage_dims=prep["stage_dims"], pad=prep["pad"], dils=prep["dils"],
        batch_tile=b_tile))
    out = jax.block_until_ready(fwd(x, prep["bands"], prep["scale_shift"]))

    assert out.shape == (n, planes2, 16, 16), out.shape
    assert bool(jnp.all(out >= 0.0))           # ReLU output is non-negative
    assert bool(jnp.all(jnp.isfinite(out)))

    # Numerical check vs pure-JAX reference (bf16 MXU operands -> loose tol).
    ref = _ref_convblock(x, params, dilation, padding)
    np.testing.assert_allclose(np.asarray(out), np.asarray(ref),
                               rtol=5e-2, atol=5e-2)

    print("KERNEL_OK")
</pallas_src>

<mosaic_0001>
module attributes {stable_mosaic.version = 11 : i64} {
  func.func @_convblock_kernel(%arg0: i32, %arg1: memref<2x16x64xf32, #tpu.memory_space<vmem>>, %arg2: memref<192x128xbf16, #tpu.memory_space<vmem>>, %arg3: memref<384x128xbf16, #tpu.memory_space<vmem>>, %arg4: memref<384x128xbf16, #tpu.memory_space<vmem>>, %arg5: memref<2x128xf32, #tpu.memory_space<vmem>>, %arg6: memref<2x128xf32, #tpu.memory_space<vmem>>, %arg7: memref<2x128xf32, #tpu.memory_space<vmem>>, %arg8: memref<2x16x128xf32, #tpu.memory_space<vmem>>) attributes {dimension_semantics = [#tpu.dimension_semantics<parallel>], iteration_bounds = array<i64: 1>, scalar_prefetch = 0 : i64, scratch_operands = 0 : i64, tpu.core_type = #tpu.core_type<tc>, window_params = [{transform_indices = @transform_0, window_bounds = array<i64: 2, 16, 64>}, {pipeline_mode = #tpu.pipeline_mode<synchronous>, transform_indices = @transform_1, window_bounds = array<i64: 192, 128>}, {pipeline_mode = #tpu.pipeline_mode<synchronous>, transform_indices = @transform_2, window_bounds = array<i64: 384, 128>}, {pipeline_mode = #tpu.pipeline_mode<synchronous>, transform_indices = @transform_3, window_bounds = array<i64: 384, 128>}, {pipeline_mode = #tpu.pipeline_mode<synchronous>, transform_indices = @transform_4, window_bounds = array<i64: 2, 128>}, {pipeline_mode = #tpu.pipeline_mode<synchronous>, transform_indices = @transform_5, window_bounds = array<i64: 2, 128>}, {pipeline_mode = #tpu.pipeline_mode<synchronous>, transform_indices = @transform_6, window_bounds = array<i64: 2, 128>}, {transform_indices = @transform_7, window_bounds = array<i64: 2, 16, 128>}]} {
    %c0 = arith.constant 0 : index
    %c0_0 = arith.constant 0 : index
    %c0_1 = arith.constant 0 : index
    %0 = vector.load %arg1[%c0, %c0_0, %c0_1] : memref<2x16x64xf32, #tpu.memory_space<vmem>>, vector<2x16x64xf32>
    %cst = arith.constant 0.000000e+00 : f32
    %1 = vector.broadcast %cst : f32 to vector<2x1x64xf32>
    %2 = tpu.concatenate %1, %0, %1 in 1 : vector<2x1x64xf32>, vector<2x16x64xf32>, vector<2x1x64xf32> -> vector<2x18x64xf32>
    %3 = vector.extract_strided_slice %2 {offsets = [0, 0, 0], sizes = [2, 16, 64], strides = [1, 1, 1]} : vector<2x18x64xf32> to vector<2x16x64xf32>
    %4 = vector.extract_strided_slice %2 {offsets = [0, 1, 0], sizes = [2, 16, 64], strides = [1, 1, 1]} : vector<2x18x64xf32> to vector<2x16x64xf32>
    %5 = vector.extract_strided_slice %2 {offsets = [0, 2, 0], sizes = [2, 16, 64], strides = [1, 1, 1]} : vector<2x18x64xf32> to vector<2x16x64xf32>
    %6 = tpu.concatenate %3, %4, %5 in 2 : vector<2x16x64xf32>, vector<2x16x64xf32>, vector<2x16x64xf32> -> vector<2x16x192xf32>
    %7 = vector.shape_cast %6 : vector<2x16x192xf32> to vector<32x192xf32>
    %8 = arith.truncf %7 : vector<32x192xf32> to vector<32x192xbf16>
    %c0_2 = arith.constant 0 : index
    %c0_3 = arith.constant 0 : index
    %9 = vector.load %arg2[%c0_2, %c0_3] : memref<192x128xbf16, #tpu.memory_space<vmem>>, vector<192x128xbf16>
    %cst_4 = arith.constant dense<0.000000e+00> : vector<32x128xf32>
    %10 = tpu.matmul %8, %9, %cst_4 {dimension_numbers = #tpu.dot_dimension_numbers<[1], [0], [0], [1], [0, 0, 1, 1], [], []>} : vector<32x192xbf16>, vector<192x128xbf16>, vector<32x128xf32> -> vector<32x128xf32>
    %c0_5 = arith.constant 0 : index
    %c0_6 = arith.constant 0 : index
    %11 = vector.load %arg5[%c0_5, %c0_6] : memref<2x128xf32, #tpu.memory_space<vmem>>, vector<1x128xf32>
    %12 = vector.broadcast %11 : vector<1x128xf32> to vector<32x128xf32>
    %13 = arith.mulf %10, %12 : vector<32x128xf32>
    %c1 = arith.constant 1 : index
    %c0_7 = arith.constant 0 : index
    %14 = vector.load %arg5[%c1, %c0_7] : memref<2x128xf32, #tpu.memory_space<vmem>>, vector<1x128xf32>
    %15 = vector.broadcast %14 : vector<1x128xf32> to vector<32x128xf32>
    %16 = arith.addf %13, %15 : vector<32x128xf32>
    %cst_8 = arith.constant 0.000000e+00 : f32
    %17 = vector.broadcast %cst_8 : f32 to vector<32x128xf32>
    %18 = arith.maximumf %16, %17 : vector<32x128xf32>
    %19 = vector.shape_cast %18 : vector<32x128xf32> to vector<2x16x128xf32>
    %cst_9 = arith.constant 0.000000e+00 : f32
    %20 = vector.broadcast %cst_9 : f32 to vector<2x1x128xf32>
    %21 = tpu.concatenate %20, %19, %20 in 1 : vector<2x1x128xf32>, vector<2x16x128xf32>, vector<2x1x128xf32> -> vector<2x18x128xf32>
    %22 = vector.extract_strided_slice %21 {offsets = [0, 0, 0], sizes = [2, 16, 128], strides = [1, 1, 1]} : vector<2x18x128xf32> to vector<2x16x128xf32>
    %23 = vector.extract_strided_slice %21 {offsets = [0, 1, 0], sizes = [2, 16, 128], strides = [1, 1, 1]} : vector<2x18x128xf32> to vector<2x16x128xf32>
    %24 = vector.extract_strided_slice %21 {offsets = [0, 2, 0], sizes = [2, 16, 128], strides = [1, 1, 1]} : vector<2x18x128xf32> to vector<2x16x128xf32>
    %25 = tpu.concatenate %22, %23, %24 in 2 : vector<2x16x128xf32>, vector<2x16x128xf32>, vector<2x16x128xf32> -> vector<2x16x384xf32>
    %26 = vector.shape_cast %25 : vector<2x16x384xf32> to vector<32x384xf32>
    %27 = arith.truncf %26 : vector<32x384xf32> to vector<32x384xbf16>
    %c0_10 = arith.constant 0 : index
    %c0_11 = arith.constant 0 : index
    %28 = vector.load %arg3[%c0_10, %c0_11] : memref<384x128xbf16, #tpu.memory_space<vmem>>, vector<384x128xbf16>
    %cst_12 = arith.constant dense<0.000000e+00> : vector<32x128xf32>
    %29 = tpu.matmul %27, %28, %cst_12 {dimension_numbers = #tpu.dot_dimension_numbers<[1], [0], [0], [1], [0, 0, 1, 1], [], []>} : vector<32x384xbf16>, vector<384x128xbf16>, vector<32x128xf32> -> vector<32x128xf32>
    %c0_13 = arith.constant 0 : index
    %c0_14 = arith.constant 0 : index
    %30 = vector.load %arg6[%c0_13, %c0_14] : memref<2x128xf32, #tpu.memory_space<vmem>>, vector<1x128xf32>
    %31 = vector.broadcast %30 : vector<1x128xf32> to vector<32x128xf32>
    %32 = arith.mulf %29, %31 : vector<32x128xf32>
    %c1_15 = arith.constant 1 : index
    %c0_16 = arith.constant 0 : index
    %33 = vector.load %arg6[%c1_15, %c0_16] : memref<2x128xf32, #tpu.memory_space<vmem>>, vector<1x128xf32>
    %34 = vector.broadcast %33 : vector<1x128xf32> to vector<32x128xf32>
    %35 = arith.addf %32, %34 : vector<32x128xf32>
    %cst_17 = arith.constant 0.000000e+00 : f32
    %36 = vector.broadcast %cst_17 : f32 to vector<32x128xf32>
    %37 = arith.maximumf %35, %36 : vector<32x128xf32>
    %38 = vector.shape_cast %37 : vector<32x128xf32> to vector<2x16x128xf32>
    %cst_18 = arith.constant 0.000000e+00 : f32
    %39 = vector.broadcast %cst_18 : f32 to vector<2x1x128xf32>
    %40 = tpu.concatenate %39, %38, %39 in 1 : vector<2x1x128xf32>, vector<2x16x128xf32>, vector<2x1x128xf32> -> vector<2x18x128xf32>
    %41 = vector.extract_strided_slice %40 {offsets = [0, 0, 0], sizes = [2, 16, 128], strides = [1, 1, 1]} : vector<2x18x128xf32> to vector<2x16x128xf32>
    %42 = vector.extract_strided_slice %40 {offsets = [0, 1, 0], sizes = [2, 16, 128], strides = [1, 1, 1]} : vector<2x18x128xf32> to vector<2x16x128xf32>
    %43 = vector.extract_strided_slice %40 {offsets = [0, 2, 0], sizes = [2, 16, 128], strides = [1, 1, 1]} : vector<2x18x128xf32> to vector<2x16x128xf32>
    %44 = tpu.concatenate %41, %42, %43 in 2 : vector<2x16x128xf32>, vector<2x16x128xf32>, vector<2x16x128xf32> -> vector<2x16x384xf32>
    %45 = vector.shape_cast %44 : vector<2x16x384xf32> to vector<32x384xf32>
    %46 = arith.truncf %45 : vector<32x384xf32> to vector<32x384xbf16>
    %c0_19 = arith.constant 0 : index
    %c0_20 = arith.constant 0 : index
    %47 = vector.load %arg4[%c0_19, %c0_20] : memref<384x128xbf16, #tpu.memory_space<vmem>>, vector<384x128xbf16>
    %cst_21 = arith.constant dense<0.000000e+00> : vector<32x128xf32>
    %48 = tpu.matmul %46, %47, %cst_21 {dimension_numbers = #tpu.dot_dimension_numbers<[1], [0], [0], [1], [0, 0, 1, 1], [], []>} : vector<32x384xbf16>, vector<384x128xbf16>, vector<32x128xf32> -> vector<32x128xf32>
    %c0_22 = arith.constant 0 : index
    %c0_23 = arith.constant 0 : index
    %49 = vector.load %arg7[%c0_22, %c0_23] : memref<2x128xf32, #tpu.memory_space<vmem>>, vector<1x128xf32>
    %50 = vector.broadcast %49 : vector<1x128xf32> to vector<32x128xf32>
    %51 = arith.mulf %48, %50 : vector<32x128xf32>
    %c1_24 = arith.constant 1 : index
    %c0_25 = arith.constant 0 : index
    %52 = vector.load %arg7[%c1_24, %c0_25] : memref<2x128xf32, #tpu.memory_space<vmem>>, vector<1x128xf32>
    %53 = vector.broadcast %52 : vector<1x128xf32> to vector<32x128xf32>
    %54 = arith.addf %51, %53 : vector<32x128xf32>
    %cst_26 = arith.constant 0.000000e+00 : f32
    %55 = vector.broadcast %cst_26 : f32 to vector<32x128xf32>
    %56 = arith.maximumf %54, %55 : vector<32x128xf32>
    %57 = vector.shape_cast %56 : vector<32x128xf32> to vector<2x16x128xf32>
    %c0_27 = arith.constant 0 : index
    %c0_28 = arith.constant 0 : index
    %c0_29 = arith.constant 0 : index
    %58 = vector.load %arg8[%c0_27, %c0_28, %c0_29] : memref<2x16x128xf32, #tpu.memory_space<vmem>>, vector<2x16x128xf32>
    tpu.vector_store %arg8[%c0_27, %c0_28, %c0_29], %57 {strides = array<i32>} : memref<2x16x128xf32, #tpu.memory_space<vmem>>, vector<2x16x128xf32>,
    return
  }
  func.func @transform_0(%arg0: i32) -> (i32, i32, i32) {
    %c0_i32 = arith.constant 0 : i32
    %c0_i32_0 = arith.constant 0 : i32
    %c0_i32_1 = arith.constant 0 : i32
    return %arg0, %c0_i32, %c0_i32_0 : i32, i32, i32
  }
  func.func @transform_1(%arg0: i32) -> (i32, i32) {
    %c0_i32 = arith.constant 0 : i32
    %c0_i32_0 = arith.constant 0 : i32
    %c0_i32_1 = arith.constant 0 : i32
    return %c0_i32, %c0_i32_0 : i32, i32
  }
  func.func @transform_2(%arg0: i32) -> (i32, i32) {
    %c0_i32 = arith.constant 0 : i32
    %c0_i32_0 = arith.constant 0 : i32
    %c0_i32_1 = arith.constant 0 : i32
    return %c0_i32, %c0_i32_0 : i32, i32
  }
  func.func @transform_3(%arg0: i32) -> (i32, i32) {
    %c0_i32 = arith.constant 0 : i32
    %c0_i32_0 = arith.constant 0 : i32
    %c0_i32_1 = arith.constant 0 : i32
    return %c0_i32, %c0_i32_0 : i32, i32
  }
  func.func @transform_4(%arg0: i32) -> (i32, i32) {
    %c0_i32 = arith.constant 0 : i32
    %c0_i32_0 = arith.constant 0 : i32
    %c0_i32_1 = arith.constant 0 : i32
    return %c0_i32, %c0_i32_0 : i32, i32
  }
  func.func @transform_5(%arg0: i32) -> (i32, i32) {
    %c0_i32 = arith.constant 0 : i32
    %c0_i32_0 = arith.constant 0 : i32
    %c0_i32_1 = arith.constant 0 : i32
    return %c0_i32, %c0_i32_0 : i32, i32
  }
  func.func @transform_6(%arg0: i32) -> (i32, i32) {
    %c0_i32 = arith.constant 0 : i32
    %c0_i32_0 = arith.constant 0 : i32
    %c0_i32_1 = arith.constant 0 : i32
    return %c0_i32, %c0_i32_0 : i32, i32
  }
  func.func @transform_7(%arg0: i32) -> (i32, i32, i32) {
    %c0_i32 = arith.constant 0 : i32
    %c0_i32_0 = arith.constant 0 : i32
    %c0_i32_1 = arith.constant 0 : i32
    return %arg0, %c0_i32, %c0_i32_0 : i32, i32, i32
  }
}

</mosaic_0001>

<bundles_post_ra>
// kernel: convblock_forward.1
= control target key start
LH: loop header
LB: loop body
LE: loop exit
PB: predicated region body
PF: predicated region fallthrough
CT: control target
= control target key end

     0   :  { %12 = vsyncpa [#allocation3], 0  ;;  %s1336_s24 = smov [#allocation2]   ;;  %s1671_s0 = inlined_call_operand.vmem [shape: f32[2,16,64], index: 0, kind: input, shape index: {}]   ;;  %s1672_s1 = inlined_call_operand.hbm [shape: bf16[192,128], index: 1, kind: input, shape index: {}]   ;;  %s1673_s2 = inlined_call_operand.vmem [shape: bf16[384,128], index: 2, kind: input, shape index: {}]   ;;  %s1674_s3 = inlined_call_operand.vmem [shape: bf16[384,128], index: 3, kind: input, shape index: {}]   ;;  %s1675_s4 = inlined_call_operand.vmem [shape: f32[2,128], index: 4, kind: input, shape index: {}]   ;;  %s1676_s5 = inlined_call_operand.vmem [shape: f32[2,128], index: 5, kind: input, shape index: {}]   ;;  %s1677_s6 = inlined_call_operand.vmem [shape: f32[2,128], index: 6, kind: input, shape index: {}]   ;;  %s1678_s7 = inlined_call_operand.vmem [shape: f32[2,16,128], index: 7, kind: output, shape index: {}]  }
   0x1   :  { %s20_s25 = sshll.u32 %s1336_s24, 4  ;;  %s21_s25 = int_to_ptr.vmem [resolvable:$true] %s20_s25 }
   0x2   :  { %s1322_s26 = scalar_lea.vmem %s21_s25, 1536  ;;  %p1327_p1 = scmp.lt.s32.totalorder %s21_s25, %s21_s25 }
   0x3   :  { %p1323_p0 = scmp.ne.s32.totalorder %s21_s25, %s1322_s26  ;;  %p1328_p2 = scmp.lt.s32.totalorder %s1322_s26, %s1322_s26 }
   0x5   :  { %p1329_p3 = por %p1328_p2, %p1327_p1 }
   0x7   :  { %p1330_p4 = pnand %p1329_p3, %p1323_p0 }
   0x9   :  { %1333 = shalt.err (!%p1330_p4)
}
   0xa   :  { %s1337_s27 = smov 64   ;;  %s1338_s28 = smov 4  }
   0xb   :  { %26 = dma.hbm_to_vmem [thread:$0]  %s1672_s1, 1536, %s21_s25, [#allocation3], %s1337_s27, %s1337_s27, %s1338_s28  }
   0xc   :  { %1334 = dma.done.wait [#allocation3], 1536  }
   0xd   :  { %1335 = vsyncadd [#allocation3], 4294965760  ;;  %v1339_v0 = vmov 0   ;;  %v41_v1 = vld [vmem:[%s1671_s0] sm:$0xff]  ;;  %v42_v2 = vld [vmem:[%s1671_s0 + $0x8] sm:$0xff]  ;;  %vm49_vm0 = vcmask 1040384  }
   0xe   :  { %219 = vmatprep.subr.bf16.mxu0 %v1339_v0  ;;  %vm70_vm1 = vcmask 1046528   ;;  %v43_v3 = vld [vmem:[%s1671_s0 + $0x10] sm:$0xff]  ;;  %v50_v4 = vrot.slane %v41_v1, 7  ;;  %v51_v5 = vrot.slane %v42_v2, 7  ;;  %v44_v6 = vld [vmem:[%s1671_s0 + $0x18] sm:$0xff]  ;;  %vm93_vm2 = vcmask 1045504   ;;  %vm1079_vm4 = vmneg %vm49_vm0 }
   0xf   :  { %v53_v7 = vrot.slane %v43_v3, 7  ;;  %v54_v8 = vrot.slane %v44_v6, 7  ;;  %v1254_v9 = vld [vmem:[#allocation2 + $0x38] sm:$0xff]   ;;  %v1255_v18 = vld [vmem:[#allocation2 + $0x30] sm:$0xff]   ;;  %v1256_v28 = vld [vmem:[#allocation2 + $0x28] sm:$0xff]   ;;  %vm108_vm3 = vcmask 523264  }
  0x10   :  { %v1400_v10 = vsel %vm49_vm0, %v50_v4, %v51_v5  ;;  %v1403_v11 = vsel %vm49_vm0, 0.0, %v50_v4  ;;  %v64_v12 = vsel %vm49_vm0, %v51_v5, 0.0  ;;  %220 = vmatpush1.bf16.msra.mxu0 %v1254_v9  ;;  %v1257_v34 = vld [vmem:[#allocation2 + $0x20] sm:$0xff]   ;;  %v1258_v37 = vld [vmem:[#allocation2 + $0x18] sm:$0xff]   ;;  %v1259_v40 = vld [vmem:[#allocation2 + $0x10] sm:$0xff]   ;;  %vm1340_vm5 = vmmov 1  }
  0x11   :  { %v1407_v13 = vsel %vm49_vm0, 0.0, %v53_v7  ;;  %v71_v14 = vrot.slane %v1403_v11, 1  ;;  %v72_v15 = vrot.slane %v1400_v10, 1  ;;  %v74_v16 = vrot.slane %v64_v12, 1  ;;  %221 = vmatprep.subr.bf16.mxu0 %v1339_v0  ;;  %v1266_v38 = vld [vmem:[%s1673_s2 + $0x78] sm:$0xff]   ;;  %v1268_v41 = vld [vmem:[%s1673_s2 + $0x70] sm:$0xff]   ;;  %vm1520_vm6 = vmpackc.low %vm1340_vm5, %vm1079_vm4 }
  0x12   :  { %v1412_v17 = vsel %vm49_vm0, %v53_v7, %v54_v8  ;;  %v1415_v19 = vsel %vm49_vm0, %v54_v8, 0.0  ;;  %v76_v20 = vrot.slane %v1407_v13, 1  ;;  %v94_v29 = vrot.slane %v1403_v11, 2  ;;  %v1267_v39 = vld [vmem:[%s1673_s2 + $0x38] sm:$0xff]   ;;  %1123 = vmatprep.subr.bf16.mxu1 %v1266_v38  ;;  %v1269_v42 = vld [vmem:[%s1673_s2 + $0x30] sm:$0xff]   ;;  %v1270_v43 = vld [vmem:[%s1673_s2 + $0x68] sm:$0xff]  }
  0x13   :  { %v77_v21 = vrot.slane %v1412_v17, 1  ;;  %v73_v22 = vsel %vm70_vm1, %v71_v14, %v72_v15  ;;  %v75_v23 = vsel %vm70_vm1, %v72_v15, %v74_v16  ;;  %v79_v24 = vrot.slane %v1415_v19, 1  ;;  %1124 = vmatpush3.bf16.msra.mxu1 %v1267_v39  ;;  %v1271_v44 = vld [vmem:[%s1673_s2 + $0x28] sm:$0xff]   ;;  %v1272_v46 = vld [vmem:[%s1673_s2 + $0x60] sm:$0xff]   ;;  %v1262_v48 = vld [vmem:[#allocation2 + $0x58] sm:$0xff]  }
  0x14   :  { %v1244_v25 = vpack.i.bf16 %v75_v23, %v73_v22  ;;  %222 = vmatpush1.bf16.msra.mxu0 %v1255_v18  ;;  %v95_v31 = vrot.slane %v1400_v10, 2  ;;  %v97_v32 = vrot.slane %v64_v12, 2  ;;  %1125 = vmatprep.subr.bf16.mxu1 %v1268_v41  ;;  %v1260_v45 = vld [vmem:[#allocation2 + $0x8] sm:$0xff]   ;;  %v1261_v47 = vld [vmem:[#allocation2] sm:$0xff]   ;;  %v1263_v49 = vld [vmem:[#allocation2 + $0x50] sm:$0xff]   ;;  %v99_v52 = vrot.slane %v1407_v13, 2 }
  0x15   :  { %v78_v26 = vsel %vm70_vm1, %v76_v20, %v77_v21  ;;  %v80_v27 = vsel %vm70_vm1, %v77_v21, %v79_v24  ;;  %223 = vmatprep.subr.bf16.mxu0 %v1339_v0  ;;  %v1264_v50 = vld [vmem:[#allocation2 + $0x48] sm:$0xff]   ;;  %v1265_v51 = vld [vmem:[#allocation2 + $0x40] sm:$0xff]   ;;  %v100_v53 = vrot.slane %v1412_v17, 2  ;;  %v102_v54 = vrot.slane %v1415_v19, 2  ;;  %v1274_v7 = vld [vmem:[%s1673_s2 + $0x58] sm:$0xff]  }
  0x16   :  { %1245 = vrot.lane.b32.xlu0 %v1244_v25, %s1337_s27  ;;  %v1249_v30 = vpack.i.bf16 %v80_v27, %v78_v26  ;;  %v96_v33 = vsel %vm93_vm2, %v94_v29, %v95_v31  ;;  %v98_v35 = vsel %vm93_vm2, %v95_v31, %v97_v32  ;;  %v1273_v6 = vld [vmem:[%s1673_s2 + $0x20] sm:$0xff]   ;;  %v1275_v8 = vld [vmem:[%s1673_s2 + $0x18] sm:$0xff]   ;;  %v1276_v9 = vld [vmem:[%s1673_s2 + $0x50] sm:$0xff]  }
  0x17   :  { %v114_v36 = vpack.c.bf16 %v98_v35, %v96_v33  ;;  %1126 = vmatpush3.bf16.msra.mxu1 %v1269_v42  ;;  %v101_v56 = vsel %vm93_vm2, %v99_v52, %v100_v53  ;;  %v103_v57 = vsel %vm93_vm2, %v100_v53, %v102_v54  ;;  %v1279_v12 = vld [vmem:[%s1673_s2 + $0x8] sm:$0xff]   ;;  %v1281_v14 = vld [vmem:[%s1673_s2] sm:$0xff]   ;;  %v1282_v15 = vld [vmem:[%s1673_s2 + $0xb8] sm:$0xff]  }
  0x18   :  { %224 = vmatpush1.bf16.msra.mxu0 %v1256_v28  ;;  %1127 = vmatprep.subr.bf16.mxu1 %v1270_v43  ;;  %v116_v62 = vpack.c.bf16 %v103_v57, %v101_v56  ;;  %v1053_v16 = vld [vmem:[%s1675_s4] ss:$0 sm:$0xff]  ;;  %v1054_v18 = vld [vmem:[%s1675_s4 + $0x1] ss:$0 sm:$0xff]  ;;  %v1283_v53 = vld [vmem:[%s1673_s2 + $0xb0] sm:$0xff]  }
  0x19   :  { %225 = vmatprep.subr.bf16.mxu0 %v1339_v0  ;;  %1051 = vmatprep.mubr.msk.bf16.mxu0 %vm108_vm3, %v114_v36 }
  0x1a   :  { %1250 = vrot.lane.b32.xlu0 %v1249_v30, %s1337_s27 }
  0x1b   :  { %1128 = vmatpush3.bf16.msra.mxu1 %v1271_v44 }
  0x1c   :  { %226 = vmatpush1.bf16.msra.mxu0 %v1257_v34  ;;  %1129 = vmatprep.subr.bf16.mxu1 %v1272_v46 }
  0x1d   :  { %227 = vmatprep.subr.bf16.mxu0 %v1339_v0 }
  0x1f   :  { %1130 = vmatpush3.bf16.msra.mxu1 %v1273_v6  ;;  %v1285_v6 = vld [vmem:[%s1673_s2 + $0xa0] sm:$0xff]  }
  0x20   :  { %228 = vmatpush1.bf16.msra.mxu0 %v1258_v37  ;;  %1131 = vmatprep.subr.bf16.mxu1 %v1274_v7 }
  0x21   :  { %229 = vmatprep.subr.bf16.mxu0 %v1339_v0 }
  0x23   :  { %1132 = vmatpush3.bf16.msra.mxu1 %v1275_v8  ;;  %v1286_v8 = vld [vmem:[%s1673_s2 + $0x98] sm:$0xff]  }
  0x24   :  { %230 = vmatpush1.bf16.msra.mxu0 %v1259_v40  ;;  %1133 = vmatprep.subr.bf16.mxu1 %v1276_v9  ;;  %v1287_v9 = vld [vmem:[%s1673_s2 + $0x90] sm:$0xff]  }
  0x25   :  { %231 = vmatprep.subr.bf16.mxu0 %v1339_v0 }
  0x28   :  { %232 = vmatpush1.bf16.msra.mxu0 %v1260_v45 }
  0x29   :  { %233 = vmatprep.subr.bf16.mxu0 %v1339_v0 }
  0x2c   :  { %234 = vmatpush1.bf16.msra.mxu0 %v1261_v47 }
  0x2d   :  { %243 = vmatprep.subr.bf16.mxu0 %v1339_v0 }
  0x30   :  { %244 = vmatpush2.bf16.msra.mxu0 %v1262_v48 }
  0x31   :  { %245 = vmatprep.subr.bf16.mxu0 %v1339_v0 }
  0x34   :  { %246 = vmatpush2.bf16.msra.mxu0 %v1263_v49 }
  0x35   :  { %247 = vmatprep.subr.bf16.mxu0 %v1339_v0 }
  0x38   :  { %248 = vmatpush2.bf16.msra.mxu0 %v1264_v50 }
  0x39   :  { %249 = vmatprep.subr.bf16.mxu0 %v1339_v0 }
  0x3c   :  { %250 = vmatpush2.bf16.msra.mxu0 %v1265_v51 }
  0x88   :  { %v1246_v55 = vpop.permute.xlu0 %1245 }
  0x89   :  { %v1248_v58 = vunpack.i.h.bf16 %v1246_v55  ;;  %v1247_v59 = vunpack.i.l.bf16 %v1246_v55 }
  0x8b   :  { %v109_v60 = vsel %vm108_vm3, %v1403_v11, %v1247_v59  ;;  %v110_v61 = vsel %vm108_vm3, %v1400_v10, %v1248_v58  ;;  %v1277_v10 = vld [vmem:[%s1673_s2 + $0x10] sm:$0xff]   ;;  %v1278_v11 = vld [vmem:[%s1673_s2 + $0x48] sm:$0xff]  }
  0x8c   :  { %v113_v63 = vpack.c.bf16 %v110_v61, %v109_v60  ;;  %v1251_v0 = vpop.permute.xlu0 %1250  ;;  %1134 = vmatpush3.bf16.msra.mxu1 %v1277_v10  ;;  %v1288_v10 = vld [vmem:[%s1673_s2 + $0x88] sm:$0xff]  }
  0x8d   :  { %v1253_v1 = vunpack.i.h.bf16 %v1251_v0  ;;  %v1252_v2 = vunpack.i.l.bf16 %v1251_v0  ;;  %1135 = vmatprep.subr.bf16.mxu1 %v1278_v11  ;;  %v1289_v11 = vld [vmem:[%s1673_s2 + $0x80] sm:$0xff]  }
  0x8e   :  { %252 = vmatmul.mubr.bf16.vlgmr.msra.gmra.mxu0 %v113_v63  ;;  %v1284_v63 = vld [vmem:[%s1673_s2 + $0xa8] sm:$0xff]  }
  0x8f   :  { %1052 = vmatprep.mubr.msk.bf16.mxu0 %vm108_vm3, %v116_v62  ;;  %v111_v3 = vsel %vm108_vm3, %v1407_v13, %v1252_v2  ;;  %v112_v4 = vsel %vm108_vm3, %v1412_v17, %v1253_v1  ;;  %v1280_v13 = vld [vmem:[%s1673_s2 + $0x40] sm:$0xff]  }
  0x90   :  { %v115_v5 = vpack.c.bf16 %v112_v4, %v111_v3  ;;  %1136 = vmatpush3.bf16.msra.mxu1 %v1279_v12 }
  0x91   :  { %1137 = vmatprep.subr.bf16.mxu1 %v1280_v13 }
  0x94   :  { %1138 = vmatpush3.bf16.msra.mxu1 %v1281_v14 }
  0x95   :  { %1199 = vmatprep.subr.bf16.mxu1 %v1282_v15 }
  0x96   :  { %260 = vmatmul.mubr.bf16.gmra.mxu0 %v115_v5 }
 0x14e   :  { %v253_v17 = vpop.f32.mrf.mxu0 }
 0x14f   :  { %v273_v19 = vmul.f32 %v1053_v16, %v253_v17 }
 0x150   :  { %v255_v20 = vpop.f32.mrf.mxu0 }
 0x151   :  { %v282_v21 = vadd.f32 %v1054_v18, %v273_v19  ;;  %v1291_v19 = vld [vmem:[%s1674_s3 + $0xb8] sm:$0xff]  }
 0x152   :  { %v256_v22 = vpop.f32.mrf.mxu0  ;;  %v1292_v20 = vld [vmem:[%s1674_s3 + $0x38] sm:$0xff]  }
 0x153   :  { %v286_v23 = vmax.f32 %v282_v21, 0.0  ;;  %v274_v24 = vmul.f32 %v1053_v16, %v256_v22  ;;  %v1293_v21 = vld [vmem:[%s1674_s3 + $0x70] sm:$0xff]  }
 0x154   :  { %v258_v25 = vpop.f32.mrf.mxu0  ;;  %v1294_v22 = vld [vmem:[%s1674_s3 + $0xb0] sm:$0xff]  }
 0x155   :  { %v294_v26 = vrot.slane %v286_v23, 7  ;;  %v283_v27 = vadd.f32 %v1054_v18, %v274_v24  ;;  %v1295_v23 = vld [vmem:[%s1674_s3 + $0x30] sm:$0xff]   ;;  %v1296_v24 = vld [vmem:[%s1674_s3 + $0x68] sm:$0xff]  }
 0x156   :  { %v261_v28 = vpop.f32.mrf.mxu0  ;;  %v1297_v25 = vld [vmem:[%s1674_s3 + $0xa8] sm:$0xff]  }
 0x157   :  { %v287_v29 = vmax.f32 %v283_v27, 0.0  ;;  %v275_v30 = vmul.f32 %v1053_v16, %v261_v28  ;;  %v306_v34 = vsel %vm49_vm0, 0.0, %v294_v26  ;;  %v1299_v27 = vld [vmem:[%s1674_s3 + $0x60] sm:$0xff]  }
 0x158   :  { %v263_v31 = vpop.f32.mrf.mxu0  ;;  %v314_v40 = vrot.slane %v306_v34, 1  ;;  %v328_v60 = vrot.slane %v306_v34, 2  ;;  %v1300_v28 = vld [vmem:[%s1674_s3 + $0xa0] sm:$0xff]   ;;  %v1306_v34 = vld [vmem:[%s1674_s3 + $0x90] sm:$0xff]  }
 0x159   :  { %v295_v32 = vrot.slane %v287_v29, 7  ;;  %v284_v33 = vadd.f32 %v1054_v18, %v275_v30  ;;  %v1301_v29 = vld [vmem:[%s1674_s3 + $0x20] sm:$0xff]   ;;  %v1302_v30 = vld [vmem:[%s1674_s3 + $0x58] sm:$0xff]  }
 0x15a   :  { %v264_v35 = vpop.f32.mrf.mxu0  ;;  %v1303_v31 = vld [vmem:[%s1674_s3 + $0x98] sm:$0xff]  }
 0x15b   :  { %v308_v36 = vsel %vm49_vm0, %v295_v32, 0.0  ;;  %v288_v37 = vmax.f32 %v284_v33, 0.0  ;;  %v276_v38 = vmul.f32 %v1053_v16, %v264_v35  ;;  %v296_v39 = vsel %vm49_vm0, %v294_v26, %v295_v32  ;;  %v1304_v32 = vld [vmem:[%s1674_s3 + $0x18] sm:$0xff]   ;;  %v1305_v33 = vld [vmem:[%s1674_s3 + $0x50] sm:$0xff]  }
 0x15c   :  { %v315_v41 = vrot.slane %v296_v39, 1  ;;  %v317_v42 = vrot.slane %v308_v36, 1  ;;  %v266_v43 = vpop.f32.mrf.mxu0  ;;  %v1081_v52 = vpack.c.bf16 %v296_v39, %v294_v26  ;;  %v329_v55 = vrot.slane %v296_v39, 2  ;;  %v1298_v26 = vld [vmem:[%s1674_s3 + $0x28] sm:$0xff]   ;;  %v1307_v35 = vld [vmem:[%s1674_s3 + $0x10] sm:$0xff]   ;;  %v1311_v39 = vld [vmem:[%s1674_s3 + $0x40] sm:$0xff]  }
 0x15d   :  { %v297_v44 = vrot.slane %v288_v37, 7  ;;  %v285_v45 = vadd.f32 %v1054_v18, %v276_v38  ;;  %v331_v56 = vrot.slane %v308_v36, 2  ;;  %v1290_v18 = vld [vmem:[%s1674_s3 + $0x78] sm:$0xff]   ;;  %v1308_v36 = vld [vmem:[%s1674_s3 + $0x48] sm:$0xff]  }
 0x15e   :  { %v316_v46 = vsel %vm70_vm1, %v314_v40, %v315_v41  ;;  %v318_v47 = vsel %vm70_vm1, %v315_v41, %v317_v42  ;;  %v330_v0 = vsel %vm93_vm2, %v328_v60, %v329_v55  ;;  %1161 = vmatprep.subr.bf16.mxu0 %v1290_v18  ;;  %v1309_v37 = vld [vmem:[%s1674_s3 + $0x88] sm:$0xff]   ;;  %v1312_v40 = vld [vmem:[%s1674_s3 + $0x80] sm:$0xff]  }
 0x15f   :  { %v307_v48 = vsel %vm49_vm0, 0.0, %v297_v44  ;;  %v289_v49 = vmax.f32 %v285_v45, 0.0  ;;  %v343_v50 = vpack.c.bf16 %v318_v47, %v316_v46  ;;  %v332_v4 = vsel %vm93_vm2, %v329_v55, %v331_v56  ;;  %1162 = vmatpush3.bf16.msra.mxu0 %v1292_v20  ;;  %v1310_v38 = vld [vmem:[%s1674_s3 + $0x8] sm:$0xff]   ;;  %v1313_v41 = vld [vmem:[%s1674_s3] sm:$0xff]  }
 0x160   :  { %v319_v57 = vrot.slane %v307_v48, 1  ;;  %v344_v7 = vpack.c.bf16 %v332_v4, %v330_v0  ;;  %v333_v12 = vrot.slane %v307_v48, 2  ;;  %1163 = vmatprep.subr.bf16.mxu0 %v1293_v21  ;;  %v1088_v56 = vld [vmem:[%s1676_s5 + $0x1] ss:$0 sm:$0xff] }
 0x161   :  { %v298_v54 = vrot.slane %v289_v49, 7  ;;  %572 = vmatprep.mubr.bf16.mxu1 %v343_v50 }
 0x162   :  { %1082 = vmatmul.mubr.msk.bf16.vlgmr.msra.gmra.mxu1 %vm1520_vm6, %v1081_v52 }
 0x163   :  { %v299_v58 = vsel %vm49_vm0, %v297_v44, %v298_v54  ;;  %v309_v59 = vsel %vm49_vm0, %v298_v54, 0.0  ;;  %1200 = vmatpush3.bf16.msra.mxu1 %v1282_v15  ;;  %1164 = vmatpush3.bf16.msra.mxu0 %v1295_v23 }
 0x164   :  { %v322_v61 = vrot.slane %v309_v59, 1  ;;  %1201 = vmatprep.subr.bf16.mxu1 %v1283_v53  ;;  %v320_v62 = vrot.slane %v299_v58, 1  ;;  %v1085_v3 = vpack.c.bf16 %v299_v58, %v297_v44  ;;  %v334_v13 = vrot.slane %v299_v58, 2  ;;  %1165 = vmatprep.subr.bf16.mxu0 %v1296_v24 }
 0x165   :  { %v336_v14 = vrot.slane %v309_v59, 2 }
 0x166   :  { %v321_v1 = vsel %vm70_vm1, %v319_v57, %v320_v62  ;;  %v323_v2 = vsel %vm70_vm1, %v320_v62, %v322_v61  ;;  %v335_v16 = vsel %vm93_vm2, %v333_v12, %v334_v13 }
 0x167   :  { %1202 = vmatpush3.bf16.msra.mxu1 %v1283_v53  ;;  %v346_v5 = vpack.c.bf16 %v323_v2, %v321_v1  ;;  %v337_v15 = vsel %vm93_vm2, %v334_v13, %v336_v14  ;;  %1166 = vmatpush3.bf16.msra.mxu0 %v1298_v26  ;;  %v1087_v53 = vld [vmem:[%s1676_s5] ss:$0 sm:$0xff] }
 0x168   :  { %1203 = vmatprep.subr.bf16.mxu1 %v1284_v63  ;;  %v347_v17 = vpack.c.bf16 %v337_v15, %v335_v16  ;;  %1167 = vmatprep.subr.bf16.mxu0 %v1299_v27 }
 0x169   :  { %580 = vmatprep.mubr.bf16.mxu1 %v346_v5 }
 0x16a   :  { %1086 = vmatmul.mubr.msk.bf16.gmra.mxu1 %vm1520_vm6, %v1085_v3 }
 0x16b   :  { %1204 = vmatpush3.bf16.msra.mxu1 %v1284_v63  ;;  %1215 = vmatprep.mubr.bf16.mxu1 %v344_v7 }
 0x16c   :  { %1205 = vmatprep.subr.bf16.mxu1 %v1285_v6  ;;  %1168 = vmatpush3.bf16.msra.mxu0 %v1301_v29 }
 0x16d   :  { %1169 = vmatprep.subr.bf16.mxu0 %v1302_v30 }
 0x16f   :  { %1206 = vmatpush3.bf16.msra.mxu1 %v1285_v6 }
 0x170   :  { %1207 = vmatprep.subr.bf16.mxu1 %v1286_v8  ;;  %1170 = vmatpush3.bf16.msra.mxu0 %v1304_v32 }
 0x171   :  { %1171 = vmatprep.subr.bf16.mxu0 %v1305_v33 }
 0x173   :  { %1208 = vmatpush3.bf16.msra.mxu1 %v1286_v8 }
 0x174   :  { %1209 = vmatprep.subr.bf16.mxu1 %v1287_v9  ;;  %1172 = vmatpush3.bf16.msra.mxu0 %v1307_v35 }
 0x175   :  { %1173 = vmatprep.subr.bf16.mxu0 %v1308_v36 }
 0x177   :  { %1210 = vmatpush3.bf16.msra.mxu1 %v1287_v9 }
 0x178   :  { %1211 = vmatprep.subr.bf16.mxu1 %v1288_v10  ;;  %1174 = vmatpush3.bf16.msra.mxu0 %v1310_v38 }
 0x179   :  { %1175 = vmatprep.subr.bf16.mxu0 %v1311_v39 }
 0x17b   :  { %1212 = vmatpush3.bf16.msra.mxu1 %v1288_v10 }
 0x17c   :  { %1213 = vmatprep.subr.bf16.mxu1 %v1289_v11  ;;  %1176 = vmatpush3.bf16.msra.mxu0 %v1313_v41 }
 0x17f   :  { %1214 = vmatpush3.bf16.msra.mxu1 %v1289_v11 }
 0x180   :  { %1219 = vmatprep.subr.bf16.mxu1 %v1291_v19 }
 0x182   :  { %1216 = vmatmul.mubr.bf16.vlgmr.msra.gmra.mxu1 %v347_v17 }
 0x183   :  { %1220 = vmatpush3.bf16.msra.mxu1 %v1291_v19 }
 0x184   :  { %1221 = vmatprep.subr.bf16.mxu1 %v1294_v22 }
 0x187   :  { %1222 = vmatpush3.bf16.msra.mxu1 %v1294_v22 }
 0x188   :  { %1223 = vmatprep.subr.bf16.mxu1 %v1297_v25 }
 0x18b   :  { %1224 = vmatpush3.bf16.msra.mxu1 %v1297_v25 }
 0x18c   :  { %1225 = vmatprep.subr.bf16.mxu1 %v1300_v28 }
 0x18f   :  { %1226 = vmatpush3.bf16.msra.mxu1 %v1300_v28 }
 0x190   :  { %1227 = vmatprep.subr.bf16.mxu1 %v1303_v31 }
 0x193   :  { %1228 = vmatpush3.bf16.msra.mxu1 %v1303_v31 }
 0x194   :  { %1229 = vmatprep.subr.bf16.mxu1 %v1306_v34 }
 0x197   :  { %1230 = vmatpush3.bf16.msra.mxu1 %v1306_v34 }
 0x198   :  { %1231 = vmatprep.subr.bf16.mxu1 %v1309_v37 }
 0x19b   :  { %1232 = vmatpush3.bf16.msra.mxu1 %v1309_v37 }
 0x19c   :  { %1233 = vmatprep.subr.bf16.mxu1 %v1312_v40 }
 0x19f   :  { %1234 = vmatpush3.bf16.msra.mxu1 %v1312_v40 }
 0x222   :  { %v1139_v42 = vpop.f32.mrf.mxu1 }
 0x224   :  { %v1140_v43 = vpop.f32.mrf.mxu1 }
 0x225   :  { %v1141_v54 = vadd.f32 %v1140_v43, %v1139_v42 }
 0x226   :  { %v1142_v44 = vpop.f32.mrf.mxu1 }
 0x228   :  { %v1143_v45 = vpop.f32.mrf.mxu1 }
 0x229   :  { %v1144_v62 = vadd.f32 %v1143_v45, %v1142_v44 }
 0x22a   :  { %v1145_v46 = vpop.f32.mrf.mxu1 }
 0x22c   :  { %v1146_v47 = vpop.f32.mrf.mxu1 }
 0x22d   :  { %v1147_v50 = vadd.f32 %v1146_v47, %v1145_v46 }
 0x22e   :  { %v1148_v48 = vpop.f32.mrf.mxu1 }
 0x230   :  { %v1149_v49 = vpop.f32.mrf.mxu1 }
 0x231   :  { %v1150_v58 = vadd.f32 %v1149_v49, %v1148_v48 }
 0x242   :  { %v1217_v52 = vpop.f32.mrf.mxu1 }
 0x243   :  { %v632_v55 = vadd.f32 %v1217_v52, %v1147_v50 }
 0x244   :  { %v623_v57 = vpop.f32.mrf.mxu1 }
 0x245   :  { %v645_v59 = vmul.f32 %v1087_v53, %v632_v55  ;;  %v624_v60 = vadd.f32 %v1141_v54, %v623_v57  ;;  %v1121_v55 = vld [vmem:[%s1677_s6] ss:$0 sm:$0xff] }
 0x246   :  { %v1218_v61 = vpop.f32.mrf.mxu1 }
 0x247   :  { %v654_v63 = vadd.f32 %v1088_v56, %v645_v59  ;;  %v643_v0 = vmul.f32 %v1087_v53, %v624_v60  ;;  %v635_v1 = vadd.f32 %v1218_v61, %v1150_v58  ;;  %v1122_v59 = vld [vmem:[%s1677_s6 + $0x1] ss:$0 sm:$0xff] }
 0x248   :  { %v626_v2 = vpop.f32.mrf.mxu1 }
 0x249   :  { %v658_v3 = vmax.f32 %v654_v63, 0.0  ;;  %v652_v4 = vadd.f32 %v1088_v56, %v643_v0  ;;  %v646_v5 = vmul.f32 %v1087_v53, %v635_v1  ;;  %v627_v6 = vadd.f32 %v1144_v62, %v626_v2 }
 0x24b   :  { %v656_v7 = vmax.f32 %v652_v4, 0.0  ;;  %v655_v8 = vadd.f32 %v1088_v56, %v646_v5  ;;  %v644_v9 = vmul.f32 %v1087_v53, %v627_v6  ;;  %v667_v10 = vrot.slane %v658_v3, 7 }
 0x24d   :  { %v664_v11 = vrot.slane %v656_v7, 7  ;;  %v659_v12 = vmax.f32 %v655_v8, 0.0  ;;  %v653_v13 = vadd.f32 %v1088_v56, %v644_v9  ;;  %v677_v16 = vsel %vm49_vm0, 0.0, %v667_v10 }
 0x24e   :  { %v703_v25 = vrot.slane %v677_v16, 2  ;;  %v689_v28 = vrot.slane %v677_v16, 1 }
 0x24f   :  { %v668_v14 = vrot.slane %v659_v12, 7  ;;  %v657_v15 = vmax.f32 %v653_v13, 0.0  ;;  %v676_v17 = vsel %vm49_vm0, 0.0, %v664_v11 }
 0x250   :  { %v684_v31 = vrot.slane %v676_v17, 1  ;;  %v698_v33 = vrot.slane %v676_v17, 2 }
 0x251   :  { %v669_v18 = vsel %vm49_vm0, %v667_v10, %v668_v14  ;;  %v679_v19 = vsel %vm49_vm0, %v668_v14, 0.0  ;;  %v665_v20 = vrot.slane %v657_v15, 7 }
 0x252   :  { %v692_v21 = vrot.slane %v679_v19, 1  ;;  %v704_v22 = vrot.slane %v669_v18, 2  ;;  %v706_v23 = vrot.slane %v679_v19, 2  ;;  %v690_v24 = vrot.slane %v669_v18, 1 }
 0x253   :  { %v666_v26 = vsel %vm49_vm0, %v664_v11, %v665_v20  ;;  %v678_v27 = vsel %vm49_vm0, %v665_v20, 0.0  ;;  %v1119_v48 = vpack.c.bf16 %v669_v18, %v667_v10 }
 0x254   :  { %v687_v29 = vrot.slane %v678_v27, 1  ;;  %v701_v30 = vrot.slane %v678_v27, 2  ;;  %v685_v32 = vrot.slane %v666_v26, 1  ;;  %v699_v34 = vrot.slane %v666_v26, 2 }
 0x255   :  { %v705_v35 = vsel %vm93_vm2, %v703_v25, %v704_v22  ;;  %v707_v36 = vsel %vm93_vm2, %v704_v22, %v706_v23  ;;  %v691_v39 = vsel %vm70_vm1, %v689_v28, %v690_v24  ;;  %v693_v40 = vsel %vm70_vm1, %v690_v24, %v692_v21 }
 0x256   :  { %v686_v37 = vsel %vm70_vm1, %v684_v31, %v685_v32  ;;  %v688_v38 = vsel %vm70_vm1, %v685_v32, %v687_v29  ;;  %v700_v42 = vsel %vm93_vm2, %v698_v33, %v699_v34  ;;  %v702_v43 = vsel %vm93_vm2, %v699_v34, %v701_v30 }
 0x257   :  { %v713_v41 = vpack.c.bf16 %v688_v38, %v686_v37  ;;  %v1115_v44 = vpack.c.bf16 %v666_v26, %v664_v11  ;;  %v714_v45 = vpack.c.bf16 %v702_v43, %v700_v42  ;;  %v717_v46 = vpack.c.bf16 %v707_v36, %v705_v35 }
 0x258   :  { %v716_v47 = vpack.c.bf16 %v693_v40, %v691_v39 }
 0x259   :  { %942 = vmatprep.mubr.bf16.mxu0 %v713_v41  ;;  %1235 = vmatprep.mubr.bf16.mxu1 %v714_v45 }
 0x25a   :  { %1116 = vmatmul.mubr.msk.bf16.vlgmr.msra.gmra.mxu0 %vm1520_vm6, %v1115_v44  ;;  %1236 = vmatmul.mubr.bf16.vlgmr.msra.gmra.mxu1 %v717_v46 }
 0x25b   :  { %950 = vmatprep.mubr.bf16.mxu0 %v716_v47 }
 0x262   :  { %1120 = vmatmul.mubr.msk.bf16.gmra.mxu0 %vm1520_vm6, %v1119_v48 }
 0x31a   :  { %v1177_v49 = vpop.f32.mrf.mxu0  ;;  %v1237_v50 = vpop.f32.mrf.mxu1 }
 0x31c   :  { %v1178_v52 = vpop.f32.mrf.mxu0  ;;  %v993_v54 = vpop.f32.mrf.mxu1 }
 0x31d   :  { %v1179_v53 = vadd.f32 %v1178_v52, %v1177_v49 }
 0x31e   :  { %v1180_v56 = vpop.f32.mrf.mxu0  ;;  %v1238_v58 = vpop.f32.mrf.mxu1 }
 0x31f   :  { %v994_v57 = vadd.f32 %v1179_v53, %v993_v54 }
 0x320   :  { %v1181_v60 = vpop.f32.mrf.mxu0  ;;  %v996_v62 = vpop.f32.mrf.mxu1 }
 0x321   :  { %v1013_v61 = vmul.f32 %v1121_v55, %v994_v57  ;;  %v1182_v51 = vadd.f32 %v1181_v60, %v1180_v56 }
 0x322   :  { %v1183_v63 = vpop.f32.mrf.mxu0 }
 0x323   :  { %v1022_v0 = vadd.f32 %v1122_v59, %v1013_v61  ;;  %v997_v1 = vadd.f32 %v1182_v51, %v996_v62 }
 0x324   :  { %v1184_v2 = vpop.f32.mrf.mxu0 }
 0x325   :  { %v1026_v3 = vmax.f32 %v1022_v0, 0.0  ;;  %v1014_v4 = vmul.f32 %v1121_v55, %v997_v1  ;;  %v1185_v5 = vadd.f32 %v1184_v2, %v1183_v63 }
 0x326   :  { %v1186_v6 = vpop.f32.mrf.mxu0 }
 0x327   :  { %1030 = vst [vmem:[%s1678_s7] sm:$0xff] %v1026_v3  ;;  %v1023_v7 = vadd.f32 %v1122_v59, %v1014_v4  ;;  %v1002_v8 = vadd.f32 %v1237_v50, %v1185_v5 }
 0x328   :  { %v1187_v9 = vpop.f32.mrf.mxu0 }
 0x329   :  { %v1027_v10 = vmax.f32 %v1023_v7, 0.0  ;;  %v1015_v11 = vmul.f32 %v1121_v55, %v1002_v8  ;;  %v1188_v12 = vadd.f32 %v1187_v9, %v1186_v6 }
 0x32b   :  { %1031 = vst [vmem:[%s1678_s7 + $0x8] sm:$0xff] %v1027_v10  ;;  %v1024_v13 = vadd.f32 %v1122_v59, %v1015_v11  ;;  %v1005_v14 = vadd.f32 %v1238_v58, %v1188_v12 }
 0x32d   :  { %v1028_v15 = vmax.f32 %v1024_v13, 0.0  ;;  %v1016_v16 = vmul.f32 %v1121_v55, %v1005_v14 }
 0x32f   :  { %1032 = vst [vmem:[%s1678_s7 + $0x10] sm:$0xff] %v1028_v15  ;;  %v1025_v17 = vadd.f32 %v1122_v59, %v1016_v16 }
 0x331   :  { %v1029_v18 = vmax.f32 %v1025_v17, 0.0 }
 0x333   :  { %1033 = vst [vmem:[%s1678_s7 + $0x18] sm:$0xff] %v1029_v18 }
 0x334   :  { %1038 = vsyncpa [#allocation3], 1 }

</bundles_post_ra>
